<compile_context>
chip_gen: v6e
topology: v6e:2x2x1
jax: 0.10.0
libtpu: 0.0.40
codegen_flags: <defaults>
</compile_context>

<pallas_src>
import functools

import jax
import jax.numpy as jnp
from jax.experimental import pallas as pl
from jax.experimental.pallas import tpu as pltpu

_LANE = 128     # lane width (last dim tiling)
_SUBLANE = 8    # sublane width (second-to-last dim tiling)


def _round_up(x, m):
    return ((x + m - 1) // m) * m


def _mlp_fused_kernel(x_ref, w_ref, b_ref, o_ref, *, layer_meta, slope):
    """Fused forward for the whole MLP.

    x_ref: [B_pad, D0_pad] f32          (feature dim zero-padded to 128k)
    w_ref: [sum(Din_pad), max_Dout_pad] bf16, layer li's weight occupies rows
           [row_off, row_off + Din_pad) and columns [0, Dout_pad) (rest zero).
    b_ref: [round_up(n_layers, 8), max_Dout_pad] f32, row li = bias of layer li.
    o_ref: [B_pad, Dout_pad_last] f32   (lane-dense store).

    Hidden layers: y = act(h @ W + b); final layer: y = h @ W + b.
    act = ReLU when slope == 0.0, else LeakyReLU(slope) (0 <= slope < 1).
    Zero-padded columns stay exactly zero through every layer (0-weight cols,
    0 bias, act(0)=0), so padded math is equivalent to the unpadded MLP.
    """
    n_layers = len(layer_meta)
    h = x_ref[...]                                            # f32
    for li, (row_off, din_pad, dout_pad) in enumerate(layer_meta):
        # Static, tile-aligned slices -> zero-cost views.
        w = w_ref[row_off:row_off + din_pad, :dout_pad]        # bf16
        y = jnp.dot(h.astype(jnp.bfloat16), w,
                    preferred_element_type=jnp.float32)        # MXU, f32 accum
        y = y + b_ref[li:li + 1, :dout_pad]                    # f32 bias add
        if li < n_layers - 1:                                  # hidden layers
            if slope == 0.0:
                y = jnp.maximum(y, 0.0)                        # ReLU
            else:
                y = jnp.maximum(y, slope * y)                  # LeakyReLU
        # TODO(synk): training-mode dropout (pltpu.prng_* mask) would go here.
        h = y
    o_ref[...] = h.astype(o_ref.dtype)


def pack_mlp_params(params):
    """Pack per-layer (W [Din,Dout] f32, b [1,Dout] f32) into two padded buffers.

    Returns (w_packed bf16, b_packed f32, layer_meta, out_dim) where layer_meta
    is a static tuple of (row_offset, Din_pad, Dout_pad) per layer.  All padded
    dims are multiples of 128 so in-kernel slices are tile-aligned and chained
    matmul shapes line up (Din_pad[l+1] == Dout_pad[l]).
    """
    n = len(params)
    dins = [int(w.shape[0]) for w, _ in params]
    douts = [int(w.shape[1]) for w, _ in params]
    din_pads = [_round_up(d, _LANE) for d in dins]
    dout_pads = [_round_up(d, _LANE) for d in douts]
    max_cols = max(dout_pads)

    row_offs, off = [], 0
    for dp in din_pads:
        row_offs.append(off)
        off += dp

    w_packed = jnp.zeros((off, max_cols), jnp.bfloat16)
    b_packed = jnp.zeros((_round_up(n, _SUBLANE), max_cols), jnp.float32)
    for li, (w, b) in enumerate(params):
        w_packed = w_packed.at[
            row_offs[li]:row_offs[li] + dins[li], :douts[li]
        ].set(w.astype(jnp.bfloat16))
        b_packed = b_packed.at[li, :douts[li]].set(jnp.reshape(b, (-1,)))

    layer_meta = tuple((row_offs[li], din_pads[li], dout_pads[li]) for li in range(n))
    return w_packed, b_packed, layer_meta, douts[-1]


def mlp_forward(packed, x, activation="relu", slope=0.01,
                dropout=0.0, training=False):
    """Run the entire MLP as ONE Pallas TPU kernel.

    packed: result of pack_mlp_params(params).
    x:      [B, D0] float32.
    """
    if dropout > 0.0 and training:
        # TODO(synk): implement PRNG dropout in-kernel; do not silently no-op.
        raise NotImplementedError("training-mode dropout > 0 not implemented")

    w_packed, b_packed, layer_meta, out_dim = packed
    act_slope = 0.0 if activation == "relu" else float(slope)

    B, D0 = x.shape
    B_pad = _round_up(B, _SUBLANE)
    D0_pad = layer_meta[0][1]
    dout_pad_last = layer_meta[-1][2]

    # Zero-pad input to a lane/sublane-aligned slab (layout plumbing, one-off).
    x_pad = jnp.zeros((B_pad, D0_pad), jnp.float32)
    x_pad = x_pad.at[:B, :D0].set(x.astype(jnp.float32))

    # VMEM budget guard: everything resident + the two live activations.
    max_act_cols = max(m[2] for m in layer_meta)
    resident_bytes = (x_pad.size * 4 + w_packed.size * 2 + b_packed.size * 4
                      + B_pad * dout_pad_last * 4
                      + 2 * B_pad * max_act_cols * 4)
    vmem_limit = int(min(max(4 * resident_bytes, 32 * 2 ** 20), 64 * 2 ** 20))

    flops = sum(2 * B_pad * dp * op for (_, dp, op) in layer_meta)
    cost = pl.CostEstimate(flops=flops, transcendentals=0,
                           bytes_accessed=int(resident_bytes))

    kernel = functools.partial(_mlp_fused_kernel,
                               layer_meta=layer_meta, slope=act_slope)
    vmem_spec = pl.BlockSpec(memory_space=pltpu.MemorySpace.VMEM)

    out_pad = pl.pallas_call(
        kernel,
        out_shape=jax.ShapeDtypeStruct((B_pad, dout_pad_last), jnp.float32),
        in_specs=[vmem_spec, vmem_spec, vmem_spec],
        out_specs=vmem_spec,
        compiler_params=pltpu.CompilerParams(vmem_limit_bytes=vmem_limit),
        cost_estimate=cost,
    )(x_pad, w_packed, b_packed)

    return out_pad[:B, :out_dim]


def init_mlp_params(key, input_dim, hidden_dims, output_dim, activation="relu",
                    slope=0.01):
    """Deterministic parameter init mirroring the PyTorch module's init scheme.

    Hidden layers: kaiming-uniform weights, uniform(-1, 0) bias.
    Final layer:   xavier-normal weights, uniform(-1, 0) bias.
    Weights are returned as [in, out] (already transposed for x @ W).
    """
    dims = [input_dim] + list(hidden_dims) + [output_dim]
    params = []
    n_layers = len(dims) - 1
    gain = jnp.sqrt(2.0) if activation == "relu" else jnp.sqrt(2.0 / (1.0 + slope ** 2))
    for li in range(n_layers):
        fan_in, fan_out = dims[li], dims[li + 1]
        key, kw, kb = jax.random.split(key, 3)
        if li < n_layers - 1:
            bound = gain * jnp.sqrt(3.0 / fan_in)            # kaiming uniform
            w = jax.random.uniform(kw, (fan_in, fan_out), jnp.float32, -bound, bound)
        else:
            std = jnp.sqrt(2.0 / (fan_in + fan_out))         # xavier normal
            w = std * jax.random.normal(kw, (fan_in, fan_out), jnp.float32)
        b = jax.random.uniform(kb, (1, fan_out), jnp.float32, -1.0, 0.0)
        params.append((w, b))
    return params


def mlp_reference(params, x, activation="relu", slope=0.01,
                  mxu_dtype=jnp.float32):
    """Plain-JAX reference.  mxu_dtype=bfloat16 mirrors the kernel's MXU inputs."""
    act_slope = 0.0 if activation == "relu" else slope
    h = x.astype(jnp.float32)
    n = len(params)
    for li, (w, b) in enumerate(params):
        h = jnp.dot(h.astype(mxu_dtype), w.astype(mxu_dtype),
                    preferred_element_type=jnp.float32) + b
        if li < n - 1:
            h = jnp.where(h > 0, h, act_slope * h)
    return h


if __name__ == "__main__":
    key = jax.random.PRNGKey(0)
    key, kx, kp = jax.random.split(key, 3)

    # Small shapes: MLP(input_dim=16, hidden_dims=[32, 32], output_dim=8), B=8.
    B, input_dim, hidden_dims, output_dim = 8, 16, [32, 32], 8
    x = jax.random.normal(kx, (B, input_dim), jnp.float32)

    params = init_mlp_params(kp, input_dim, hidden_dims, output_dim,
                             activation="relu", slope=0.01)
    packed = pack_mlp_params(params)

    # ReLU path.
    out = mlp_forward(packed, x, activation="relu", slope=0.01)
    out = jax.block_until_ready(out)
    assert out.shape == (B, output_dim)
    ref_bf16 = mlp_reference(params, x, activation="relu", mxu_dtype=jnp.bfloat16)
    ref_f32 = mlp_reference(params, x, activation="relu", mxu_dtype=jnp.float32)
    assert jnp.allclose(out, ref_bf16, atol=2e-3, rtol=2e-3), "ReLU mismatch (bf16 ref)"
    assert jnp.allclose(out, ref_f32, atol=1e-1, rtol=1e-1), "ReLU mismatch (f32 ref)"

    # LeakyReLU path (exercises the maximum(y, slope*y) branch).
    out_l = mlp_forward(packed, x, activation="leaky_relu", slope=0.01)
    out_l = jax.block_until_ready(out_l)
    ref_l_bf16 = mlp_reference(params, x, activation="leaky_relu", slope=0.01,
                               mxu_dtype=jnp.bfloat16)
    ref_l_f32 = mlp_reference(params, x, activation="leaky_relu", slope=0.01,
                              mxu_dtype=jnp.float32)
    assert jnp.allclose(out_l, ref_l_bf16, atol=2e-3, rtol=2e-3), "LeakyReLU mismatch (bf16 ref)"
    assert jnp.allclose(out_l, ref_l_f32, atol=1e-1, rtol=1e-1), "LeakyReLU mismatch (f32 ref)"

    print("KERNEL_OK")
</pallas_src>

<mosaic_0001>
module attributes {stable_mosaic.version = 11 : i64} {
  func.func @_mlp_fused_kernel(%arg0: memref<8x128xf32, #tpu.memory_space<vmem>>, %arg1: memref<384x128xbf16, #tpu.memory_space<vmem>>, %arg2: memref<8x128xf32, #tpu.memory_space<vmem>>, %arg3: memref<8x128xf32, #tpu.memory_space<vmem>>) attributes {dimension_semantics = [], scalar_prefetch = 0 : i64, scratch_operands = 0 : i64, tpu.core_type = #tpu.core_type<tc>} {
    %c0 = arith.constant 0 : index
    %c0_0 = arith.constant 0 : index
    %0 = vector.load %arg0[%c0, %c0_0] : memref<8x128xf32, #tpu.memory_space<vmem>>, vector<8x128xf32>
    %c0_1 = arith.constant 0 : index
    %c0_2 = arith.constant 0 : index
    %1 = vector.load %arg1[%c0_1, %c0_2] : memref<384x128xbf16, #tpu.memory_space<vmem>>, vector<128x128xbf16>
    %2 = arith.truncf %0 : vector<8x128xf32> to vector<8x128xbf16>
    %cst = arith.constant dense<0.000000e+00> : vector<8x128xf32>
    %3 = tpu.matmul %2, %1, %cst {dimension_numbers = #tpu.dot_dimension_numbers<[1], [0], [0], [1], [0, 0, 1, 1], [], []>} : vector<8x128xbf16>, vector<128x128xbf16>, vector<8x128xf32> -> vector<8x128xf32>
    %c0_3 = arith.constant 0 : index
    %c0_4 = arith.constant 0 : index
    %4 = vector.load %arg2[%c0_3, %c0_4] : memref<8x128xf32, #tpu.memory_space<vmem>>, vector<1x128xf32>
    %5 = vector.broadcast %4 : vector<1x128xf32> to vector<8x128xf32>
    %6 = arith.addf %3, %5 : vector<8x128xf32>
    %cst_5 = arith.constant 0.000000e+00 : f32
    %7 = vector.broadcast %cst_5 : f32 to vector<8x128xf32>
    %8 = arith.maximumf %6, %7 : vector<8x128xf32>
    %c128 = arith.constant 128 : index
    %c0_6 = arith.constant 0 : index
    %9 = vector.load %arg1[%c128, %c0_6] : memref<384x128xbf16, #tpu.memory_space<vmem>>, vector<128x128xbf16>
    %10 = arith.truncf %8 : vector<8x128xf32> to vector<8x128xbf16>
    %cst_7 = arith.constant dense<0.000000e+00> : vector<8x128xf32>
    %11 = tpu.matmul %10, %9, %cst_7 {dimension_numbers = #tpu.dot_dimension_numbers<[1], [0], [0], [1], [0, 0, 1, 1], [], []>} : vector<8x128xbf16>, vector<128x128xbf16>, vector<8x128xf32> -> vector<8x128xf32>
    %c1 = arith.constant 1 : index
    %c0_8 = arith.constant 0 : index
    %12 = vector.load %arg2[%c1, %c0_8] : memref<8x128xf32, #tpu.memory_space<vmem>>, vector<1x128xf32>
    %13 = vector.broadcast %12 : vector<1x128xf32> to vector<8x128xf32>
    %14 = arith.addf %11, %13 : vector<8x128xf32>
    %cst_9 = arith.constant 0.000000e+00 : f32
    %15 = vector.broadcast %cst_9 : f32 to vector<8x128xf32>
    %16 = arith.maximumf %14, %15 : vector<8x128xf32>
    %c256 = arith.constant 256 : index
    %c0_10 = arith.constant 0 : index
    %17 = vector.load %arg1[%c256, %c0_10] : memref<384x128xbf16, #tpu.memory_space<vmem>>, vector<128x128xbf16>
    %18 = arith.truncf %16 : vector<8x128xf32> to vector<8x128xbf16>
    %cst_11 = arith.constant dense<0.000000e+00> : vector<8x128xf32>
    %19 = tpu.matmul %18, %17, %cst_11 {dimension_numbers = #tpu.dot_dimension_numbers<[1], [0], [0], [1], [0, 0, 1, 1], [], []>} : vector<8x128xbf16>, vector<128x128xbf16>, vector<8x128xf32> -> vector<8x128xf32>
    %c2 = arith.constant 2 : index
    %c0_12 = arith.constant 0 : index
    %20 = vector.load %arg2[%c2, %c0_12] : memref<8x128xf32, #tpu.memory_space<vmem>>, vector<1x128xf32>
    %21 = vector.broadcast %20 : vector<1x128xf32> to vector<8x128xf32>
    %22 = arith.addf %19, %21 : vector<8x128xf32>
    %c0_13 = arith.constant 0 : index
    %c0_14 = arith.constant 0 : index
    %23 = vector.load %arg3[%c0_13, %c0_14] : memref<8x128xf32, #tpu.memory_space<vmem>>, vector<8x128xf32>
    tpu.vector_store %arg3[%c0_13, %c0_14], %22 {strides = array<i32>} : memref<8x128xf32, #tpu.memory_space<vmem>>, vector<8x128xf32>,
    return
  }
}

</mosaic_0001>

<bundles_post_ra>
// kernel: tpu_custom_call.1
= control target key start
LH: loop header
LB: loop body
LE: loop exit
PB: predicated region body
PF: predicated region fallthrough
CT: control target
= control target key end

     0   :  { %8 = vsyncpa [#allocation3], 0  ;;  %s705_s0 = inlined_call_operand.hbm [shape: f32[8,128], index: 0, kind: input, shape index: {}]   ;;  %s706_s1 = inlined_call_operand.hbm [shape: bf16[384,128], index: 1, kind: input, shape index: {}]   ;;  %s707_s2 = inlined_call_operand.hbm [shape: f32[8,128], index: 2, kind: input, shape index: {}]   ;;  %s708_s3 = inlined_call_operand.hbm [shape: f32[8,128], index: 3, kind: output, shape index: {}]  }
   0x1   :  { %9 = vsyncpa [#allocation6], 0 }
   0x2   :  { %10 = vsyncpa [#allocation4], 0  ;;  %s635_s12 = smov [#allocation5]  }
   0x3   :  { %s26_s13 = sshll.u32 %s635_s12, 4  ;;  %s27_s13 = int_to_ptr.vmem [resolvable:$true] %s26_s13 }
   0x4   :  { %s557_s14 = scalar_lea.vmem %s27_s13, 3072  ;;  %p562_p1 = scmp.lt.s32.totalorder %s27_s13, %s27_s13 }
   0x5   :  { %p558_p0 = scmp.ne.s32.totalorder %s27_s13, %s557_s14  ;;  %p563_p2 = scmp.lt.s32.totalorder %s557_s14, %s557_s14 }
   0x7   :  { %p564_p3 = por %p563_p2, %p562_p1 }
   0x9   :  { %p565_p4 = pnand %p564_p3, %p558_p0 }
   0xb   :  { %568 = shalt.err (!%p565_p4)
}
   0xc   :  { %s636_s15 = smov 64   ;;  %s637_s16 = smov 4  }
   0xd   :  { %32 = dma.hbm_to_vmem [thread:$0]  %s706_s1, 3072, %s27_s13, [#allocation6], %s636_s15, %s636_s15, %s637_s16  }
   0xe   :  { %s638_s19 = smov [#allocation2]   ;;  %s639_s21 = smov [#allocation7]  }
   0xf   :  { %s17_s20 = sshll.u32 %s638_s19, 4  ;;  %s39_s22 = sshll.u32 %s639_s21, 4  ;;  %s18_s20 = int_to_ptr.vmem [resolvable:$true] %s17_s20  ;;  %s40_s22 = int_to_ptr.vmem [resolvable:$true] %s39_s22 }
  0x10   :  { %s577_s23 = scalar_lea.vmem %s18_s20, 128  ;;  %p582_p6 = scmp.lt.s32.totalorder %s18_s20, %s18_s20 }
  0x11   :  { %p578_p5 = scmp.ne.s32.totalorder %s18_s20, %s577_s23  ;;  %p583_p7 = scmp.lt.s32.totalorder %s577_s23, %s577_s23 }
  0x13   :  { %p584_p8 = por %p583_p7, %p582_p6 }
  0x15   :  { %p585_p9 = pnand %p584_p8, %p578_p5 }
  0x17   :  { %588 = shalt.err (!%p585_p9)
}
  0x18   :  { %20 = dma.hbm_to_vmem [thread:$0]  %s705_s0, 128, %s18_s20, [#allocation3]  }
  0x19   :  { %s597_s26 = scalar_lea.vmem %s40_s22, 128  ;;  %p602_p11 = scmp.lt.s32.totalorder %s40_s22, %s40_s22 }
  0x1a   :  { %p598_p10 = scmp.ne.s32.totalorder %s40_s22, %s597_s26  ;;  %p603_p12 = scmp.lt.s32.totalorder %s597_s26, %s597_s26 }
  0x1c   :  { %p604_p13 = por %p603_p12, %p602_p11 }
  0x1e   :  { %p605_p0 = pnand %p604_p13, %p598_p10 }
  0x20   :  { %608 = shalt.err (!%p605_p0)
}
  0x21   :  { %42 = dma.hbm_to_vmem [thread:$0]  %s707_s2, 128, %s40_s22, [#allocation6]  }
  0x22   :  { %629 = dma.done.wait [#allocation3], 128  }
  0x23   :  { %630 = vsyncadd [#allocation3], 4294967168 }
  0x24   :  { %631 = dma.done.wait [#allocation6], 3200  }
  0x25   :  { %632 = vsyncadd [#allocation6], 4294964096  ;;  %v640_v0 = vmov 0.0   ;;  %vm641_vm0 = vmmov 0   ;;  %v525_v1 = vld [vmem:[#allocation5 + $0x38] sm:$0xff]   ;;  %v526_v2 = vld [vmem:[#allocation5 + $0x30] sm:$0xff]  }
  0x26   :  { %457 = vmatprep.subr.bf16.mxu0 %v640_v0  ;;  %473 = vmatprep.mubr.msk.bf16.mxu0 %vm641_vm0, %v640_v0  ;;  %v527_v3 = vld [vmem:[#allocation5 + $0x28] sm:$0xff]   ;;  %v533_v4 = vld [vmem:[#allocation5 + $0x78] sm:$0xff]   ;;  %v528_v5 = vld [vmem:[#allocation5 + $0x20] sm:$0xff]   ;;  %s642_s0 = smov [#allocation8]  }
  0x27   :  { %477 = vmatprep.subr.bf16.mxu1 %v640_v0  ;;  %493 = vmatprep.mubr.msk.bf16.mxu1 %vm641_vm0, %v640_v0  ;;  %v534_v6 = vld [vmem:[#allocation5 + $0x70] sm:$0xff]   ;;  %v529_v7 = vld [vmem:[#allocation5 + $0x18] sm:$0xff]   ;;  %v535_v8 = vld [vmem:[#allocation5 + $0x68] sm:$0xff]   ;;  %s393_s2 = sshll.u32 %s642_s0, 4  ;;  %s394_s2 = int_to_ptr.vmem [resolvable:$true] %s393_s2 }
  0x28   :  { %458 = vmatpush3.bf16.msra.mxu0 %v525_v1  ;;  %478 = vmatpush3.bf16.msra.mxu1 %v533_v4  ;;  %v530_v9 = vld [vmem:[#allocation5 + $0x10] sm:$0xff]   ;;  %v536_v10 = vld [vmem:[#allocation5 + $0x60] sm:$0xff]   ;;  %v531_v11 = vld [vmem:[#allocation5 + $0x8] sm:$0xff]   ;;  %s609_s28 = scalar_lea.vmem %s394_s2, 128  ;;  %p614_p2 = scmp.lt.s32.totalorder %s394_s2, %s394_s2 }
  0x29   :  { %459 = vmatprep.subr.bf16.mxu0 %v640_v0  ;;  %479 = vmatprep.subr.bf16.mxu1 %v640_v0  ;;  %v537_v12 = vld [vmem:[#allocation5 + $0x58] sm:$0xff]   ;;  %v532_v13 = vld [vmem:[#allocation5] sm:$0xff]   ;;  %v538_v15 = vld [vmem:[#allocation5 + $0x50] sm:$0xff]   ;;  %p610_p1 = scmp.ne.s32.totalorder %s394_s2, %s609_s28  ;;  %p615_p3 = scmp.lt.s32.totalorder %s609_s28, %s609_s28 }
  0x2a   :  { %v53_v14 = vld [vmem:[#allocation2] sm:$0xff]  ;;  %v539_v17 = vld [vmem:[#allocation5 + $0x48] sm:$0xff]   ;;  %v540_v18 = vld [vmem:[#allocation5 + $0x40] sm:$0xff]  }
  0x2b   :  { %v70_v16 = vpack.c.bf16 %v53_v14, %v53_v14  ;;  %v541_v19 = vld [vmem:[#allocation5 + $0xb8] sm:$0xff]   ;;  %v542_v20 = vld [vmem:[#allocation5 + $0xb0] sm:$0xff]   ;;  %v543_v21 = vld [vmem:[#allocation5 + $0xa8] sm:$0xff]   ;;  %p616_p4 = por %p615_p3, %p614_p2 }
  0x2c   :  { %460 = vmatpush3.bf16.msra.mxu0 %v526_v2  ;;  %480 = vmatpush3.bf16.msra.mxu1 %v534_v6  ;;  %v544_v22 = vld [vmem:[#allocation5 + $0xa0] sm:$0xff]   ;;  %v545_v23 = vld [vmem:[#allocation5 + $0x98] sm:$0xff]   ;;  %v546_v24 = vld [vmem:[#allocation5 + $0x90] sm:$0xff]  }
  0x2d   :  { %461 = vmatprep.subr.bf16.mxu0 %v640_v0  ;;  %481 = vmatprep.subr.bf16.mxu1 %v640_v0  ;;  %v403_v25 = vld [vmem:[#allocation7] ss:$0 sm:$0xff]  ;;  %v547_v33 = vld [vmem:[#allocation5 + $0x88] sm:$0xff]   ;;  %v412_v35 = vld [vmem:[#allocation7 + $0x1] ss:$0 sm:$0xff]  ;;  %p617_p5 = pnand %p616_p4, %p610_p1 }
  0x2e   :  { %v548_v34 = vld [vmem:[#allocation5 + $0x80] sm:$0xff]  }
  0x2f   :  { %v421_v43 = vld [vmem:[#allocation7 + $0x2] ss:$0 sm:$0xff] }
  0x30   :  { %462 = vmatpush3.bf16.msra.mxu0 %v527_v3  ;;  %482 = vmatpush3.bf16.msra.mxu1 %v535_v8 }
  0x31   :  { %463 = vmatprep.subr.bf16.mxu0 %v640_v0  ;;  %483 = vmatprep.subr.bf16.mxu1 %v640_v0 }
  0x34   :  { %464 = vmatpush3.bf16.msra.mxu0 %v528_v5  ;;  %484 = vmatpush3.bf16.msra.mxu1 %v536_v10 }
  0x35   :  { %465 = vmatprep.subr.bf16.mxu0 %v640_v0  ;;  %485 = vmatprep.subr.bf16.mxu1 %v640_v0 }
  0x38   :  { %466 = vmatpush3.bf16.msra.mxu0 %v529_v7  ;;  %486 = vmatpush3.bf16.msra.mxu1 %v537_v12 }
  0x39   :  { %467 = vmatprep.subr.bf16.mxu0 %v640_v0  ;;  %487 = vmatprep.subr.bf16.mxu1 %v640_v0 }
  0x3c   :  { %468 = vmatpush3.bf16.msra.mxu0 %v530_v9  ;;  %488 = vmatpush3.bf16.msra.mxu1 %v538_v15 }
  0x3d   :  { %469 = vmatprep.subr.bf16.mxu0 %v640_v0  ;;  %489 = vmatprep.subr.bf16.mxu1 %v640_v0 }
  0x40   :  { %470 = vmatpush3.bf16.msra.mxu0 %v531_v11  ;;  %490 = vmatpush3.bf16.msra.mxu1 %v539_v17 }
  0x41   :  { %471 = vmatprep.subr.bf16.mxu0 %v640_v0  ;;  %491 = vmatprep.subr.bf16.mxu1 %v640_v0 }
  0x44   :  { %472 = vmatpush3.bf16.msra.mxu0 %v532_v13  ;;  %492 = vmatpush3.bf16.msra.mxu1 %v540_v18 }
  0x45   :  { %497 = vmatprep.subr.bf16.mxu0 %v640_v0 }
  0x47   :  { %474 = vmatmul.mubr.bf16.vlgmr.msra.gmra.mxu0 %v70_v16 }
  0x48   :  { %513 = vmatprep.mubr.msk.bf16.mxu0 %vm641_vm0, %v640_v0  ;;  %498 = vmatpush3.bf16.msra.mxu0 %v541_v19 }
  0x49   :  { %499 = vmatprep.subr.bf16.mxu0 %v640_v0 }
  0x4c   :  { %500 = vmatpush3.bf16.msra.mxu0 %v542_v20 }
  0x4d   :  { %501 = vmatprep.subr.bf16.mxu0 %v640_v0 }
  0x50   :  { %502 = vmatpush3.bf16.msra.mxu0 %v543_v21 }
  0x51   :  { %503 = vmatprep.subr.bf16.mxu0 %v640_v0 }
  0x54   :  { %504 = vmatpush3.bf16.msra.mxu0 %v544_v22 }
  0x55   :  { %505 = vmatprep.subr.bf16.mxu0 %v640_v0 }
  0x58   :  { %506 = vmatpush3.bf16.msra.mxu0 %v545_v23 }
  0x59   :  { %507 = vmatprep.subr.bf16.mxu0 %v640_v0 }
  0x5c   :  { %508 = vmatpush3.bf16.msra.mxu0 %v546_v24 }
  0x5d   :  { %509 = vmatprep.subr.bf16.mxu0 %v640_v0 }
  0x60   :  { %510 = vmatpush3.bf16.msra.mxu0 %v547_v33 }
  0x61   :  { %511 = vmatprep.subr.bf16.mxu0 %v640_v0 }
  0x64   :  { %512 = vmatpush3.bf16.msra.mxu0 %v548_v34 }
 0x107   :  { %v158_v26 = vpop.f32.mrf.mxu0 }
 0x108   :  { %v159_v27 = vadd.f32 %v403_v25, %v158_v26 }
 0x109   :  { %v475_v28 = vpop.f32.mrf.mxu0 }
 0x10a   :  { %v164_v29 = vmax.f32 %v159_v27, 0.0 }
 0x10b   :  { %v161_v30 = vpop.f32.mrf.mxu0 }
 0x10c   :  { %v181_v31 = vpack.c.bf16 %v164_v29, %v164_v29 }
 0x10d   :  { %v476_v32 = vpop.f32.mrf.mxu0 }
 0x10e   :  { %494 = vmatmul.mubr.bf16.vlgmr.msra.gmra.mxu1 %v181_v31 }
 0x1ce   :  { %v269_v36 = vpop.f32.mrf.mxu1 }
 0x1cf   :  { %v270_v37 = vadd.f32 %v412_v35, %v269_v36 }
 0x1d0   :  { %v495_v38 = vpop.f32.mrf.mxu1 }
 0x1d1   :  { %v275_v39 = vmax.f32 %v270_v37, 0.0 }
 0x1d2   :  { %v272_v40 = vpop.f32.mrf.mxu1 }
 0x1d3   :  { %v292_v41 = vpack.c.bf16 %v275_v39, %v275_v39 }
 0x1d4   :  { %v496_v42 = vpop.f32.mrf.mxu1 }
 0x1d5   :  { %514 = vmatmul.mubr.bf16.vlgmr.msra.gmra.mxu0 %v292_v41 }
 0x295   :  { %v380_v44 = vpop.f32.mrf.mxu0 }
 0x296   :  { %v381_v45 = vadd.f32 %v421_v43, %v380_v44 }
 0x297   :  { %v515_v46 = vpop.f32.mrf.mxu0 }
 0x298   :  { %386 = vst [vmem:[#allocation8] sm:$0xff] %v381_v45 }
 0x299   :  { %v383_v47 = vpop.f32.mrf.mxu0 }
 0x29a   :  { %620 = shalt.err (!%p617_p5)
}
 0x29b   :  { %396 = dma.vmem_to_hbm [thread:$0]  %s394_s2, 128, %s708_s3, [#allocation4]   ;;  %v516_v48 = vpop.f32.mrf.mxu0 }
 0x29c   :  { %633 = dma.done.wait [#allocation4], 128  }
 0x29d   :  { %634 = vsyncadd [#allocation4], 4294967168 }
 0x29e   :  { %400 = vsyncpa [#allocation3], 1 }
 0x29f   :  { %401 = vsyncpa [#allocation6], 1 }
 0x2a0   :  { %402 = vsyncpa [#allocation4], 1 }

</bundles_post_ra>
